<compile_context>
chip_gen: v7x
topology: tpu7x:2x2x1
jax: 0.10.0
libtpu: 0.0.40
codegen_flags: <defaults>
</compile_context>

<pallas_src>
import functools

import jax
import jax.numpy as jnp
from jax.experimental import pallas as pl
from jax.experimental.pallas import tpu as pltpu

BN_EPS = 1e-5


def _round_up(x, m):
    return (x + m - 1) // m * m


# ---------------------------------------------------------------------------
# Pallas kernel: fused BN(scale/bias) + ReLU + 2x2-avg-pool + 1x1-conv
# ---------------------------------------------------------------------------
def _bn_relu_conv_pool_kernel(x_ref, sc_ref, bi_ref, w_ref, o_ref, *,
                              cin, pool_in_kernel):
    # x_ref : (TM, 4*Cin) bf16  space-to-depth rows of the pooled output grid
    # sc_ref: (1, 4*Cin)  f32   folded BN scale, tiled over the 4 pool taps
    # bi_ref: (1, 4*Cin)  f32   folded BN bias,  tiled over the 4 pool taps
    # w_ref : (Kw, Cp)    bf16  Kw = Cin (in-kernel pool) or 4*Cin (pool in W)
    # o_ref : (TM, Cp)    bf16  lane-dense (Cout zero-padded to Cp)
    #
    # BN + ReLU prologue in f32 on the VPU (v5e-safe; v6e/v7x could use bf16).
    y = jnp.maximum(x_ref[...].astype(jnp.float32) * sc_ref[...] + bi_ref[...], 0.0)
    if pool_in_kernel:
        # Sum the four lane-tile-aligned Cin-wide tap chunks (VPU adds are free
        # in this mem-bound regime) -> 4x fewer MXU MACs than stacked weights.
        p = (y[:, 0 * cin:1 * cin] + y[:, 1 * cin:2 * cin]
             + y[:, 2 * cin:3 * cin] + y[:, 3 * cin:4 * cin]) * 0.25
    else:
        p = y  # pool already folded into w_ref (four stacked copies of W/4)
    acc = jnp.dot(p.astype(jnp.bfloat16), w_ref[...],
                  preferred_element_type=jnp.float32)                 # MXU
    o_ref[...] = acc.astype(o_ref.dtype)


# ---------------------------------------------------------------------------
# Wrapper: Transition forward (PyTorch semantics; NCHW by default)
# ---------------------------------------------------------------------------
def transition_forward(x, gamma, beta, running_mean, running_var, w_oihw,
                       *, eps=BN_EPS, data_format="NCHW",
                       out_dtype=jnp.bfloat16):
    if data_format == "NCHW":
        N, Cin, H, W = x.shape
    elif data_format == "NHWC":
        N, H, W, Cin = x.shape
    else:
        raise ValueError(f"unsupported data_format: {data_format}")
    Cout = w_oihw.shape[0]

    # avg_pool2d(k=2, s=2) floor-mode drops a trailing odd row/col; crop it.
    Ho, Wo = H // 2, W // 2
    M = N * Ho * Wo
    Kx = 4 * Cin
    pool_in_kernel = (Cin % 128 == 0)      # tap slices stay lane-tile aligned
    Kw = Cin if pool_in_kernel else Kx
    Cp = _round_up(Cout, 128)              # lane-dense output (unmasked vst)

    # --- fold inference BatchNorm into per-channel scale / bias (f32) ---
    scale = (gamma.astype(jnp.float32)
             / jnp.sqrt(running_var.astype(jnp.float32) + eps))
    bias = beta.astype(jnp.float32) - running_mean.astype(jnp.float32) * scale
    sc4 = jnp.tile(scale, 4).reshape(1, Kx)
    bi4 = jnp.tile(bias, 4).reshape(1, Kx)

    # --- glue: bf16 space-to-depth onto the pooled grid (pure permutation) ---
    xb = x.astype(jnp.bfloat16)            # stream x in bf16 (HBM-bound kernel)
    if data_format == "NCHW":
        xr = xb[:, :, :2 * Ho, :2 * Wo].reshape(N, Cin, Ho, 2, Wo, 2)
        xr = jnp.transpose(xr, (0, 2, 4, 3, 5, 1)).reshape(M, Kx)
    else:  # NHWC: minor-axis shuffle only (cheap), no output transpose needed
        xr = xb[:, :2 * Ho, :2 * Wo, :].reshape(N, Ho, 2, Wo, 2, Cin)
        xr = jnp.transpose(xr, (0, 1, 3, 2, 4, 5)).reshape(M, Kx)

    # --- conv weights -> lane-dense padded bf16 matrix ---
    wmat = jnp.transpose(w_oihw.reshape(Cout, Cin), (1, 0))           # (Cin, Cout)
    if pool_in_kernel:
        wk = wmat                                                     # (Cin, Cout)
    else:
        wk = jnp.tile(wmat, (4, 1)) * 0.25                            # (4*Cin, Cout)
    wk = jnp.pad(wk, ((0, 0), (0, Cp - Cout))).astype(jnp.bfloat16)   # (Kw, Cp)

    # --- TM from a v7x-safe VMEM budget; guarantee several grid steps ---
    bytes_x, bytes_o = 2, 2                               # bf16 in / bf16 out
    fixed = Kw * Cp * 2 + 2 * Kx * 4                      # single-buffered w + scale + bias
    per_row = 2 * Kx * bytes_x + 2 * Cp * bytes_o         # double-buffered x / out tiles
    budget = int(0.70 * 64 * 1024 * 1024)                 # v7x VMEM = 64 MiB; ample on v5e/v6e
    tm = max(16, min((budget - fixed) // per_row, 1024) // 16 * 16)
    tm = min(tm, max(16, _round_up(pl.cdiv(M, 4), 16)))   # >=4 steps: overlap + both v7x TCs
    grid = (pl.cdiv(M, tm),)

    vmem_need = fixed + tm * per_row
    vmem_limit = int(min(max(vmem_need * 1.25 + (2 << 20), 16 * 1024 * 1024),
                         96 * 1024 * 1024))

    cost = pl.CostEstimate(
        flops=2 * M * Kw * Cp,
        transcendentals=0,
        bytes_accessed=(M * Kx * bytes_x          # x read (bf16)
                        + 2 * Kx * 4              # scale + bias (f32)
                        + Kw * Cp * 2             # weights (bf16)
                        + M * Cp * bytes_o),      # output write (bf16)
    )

    kernel = functools.partial(_bn_relu_conv_pool_kernel,
                               cin=Cin, pool_in_kernel=pool_in_kernel)

    out = pl.pallas_call(
        kernel,
        out_shape=jax.ShapeDtypeStruct((M, Cp), jnp.bfloat16),
        grid=grid,
        in_specs=[
            pl.BlockSpec((tm, Kx), lambda i: (i, 0)),
            # grid-invariant operands: single-buffered (saves VMEM for big tm)
            pl.BlockSpec((1, Kx), lambda i: (0, 0), pipeline_mode=pl.Buffered(1)),
            pl.BlockSpec((1, Kx), lambda i: (0, 0), pipeline_mode=pl.Buffered(1)),
            pl.BlockSpec((Kw, Cp), lambda i: (0, 0), pipeline_mode=pl.Buffered(1)),
        ],
        out_specs=pl.BlockSpec((tm, Cp), lambda i: (i, 0)),
        compiler_params=pltpu.CompilerParams(
            dimension_semantics=("parallel",),
            vmem_limit_bytes=vmem_limit,
        ),
        cost_estimate=cost,
    )(xr, sc4, bi4, wk)

    # --- glue: drop lane padding, restore the requested layout (bf16 passes) ---
    out = out[:, :Cout].reshape(N, Ho, Wo, Cout)
    if data_format == "NCHW":
        out = jnp.transpose(out, (0, 3, 1, 2))
    return out.astype(out_dtype)


# ---------------------------------------------------------------------------
# Pure-JAX reference (mirrors the PyTorch module op-for-op, f32)
# ---------------------------------------------------------------------------
def transition_reference(x, gamma, beta, mean, var, w_oihw, eps=BN_EPS):
    xn = (x - mean[None, :, None, None]) / jnp.sqrt(var[None, :, None, None] + eps)
    xn = xn * gamma[None, :, None, None] + beta[None, :, None, None]
    y = jnp.maximum(xn, 0.0)
    out = jax.lax.conv_general_dilated(
        y, w_oihw, window_strides=(1, 1), padding="VALID",
        dimension_numbers=("NCHW", "OIHW", "NCHW"))
    N, Co, H, W = out.shape
    return out.reshape(N, Co, H // 2, 2, W // 2, 2).mean(axis=(3, 5))


if __name__ == "__main__":
    key = jax.random.PRNGKey(0)
    kx, kw, kg, kb, km, kv = jax.random.split(key, 6)

    # Small config consistent with the module: nChannels=4, nOutChannels=2.
    N, Cin, H, W = 2, 4, 16, 16
    Cout = 2

    x = jax.random.normal(kx, (N, Cin, H, W), jnp.float32)                       # NCHW
    w = jax.random.normal(kw, (Cout, Cin, 1, 1), jnp.float32) / jnp.sqrt(Cin)    # OIHW
    gamma = 1.0 + 0.1 * jax.random.normal(kg, (Cin,), jnp.float32)
    beta = 0.1 * jax.random.normal(kb, (Cin,), jnp.float32)
    running_mean = 0.1 * jax.random.normal(km, (Cin,), jnp.float32)
    running_var = 1.0 + 0.1 * jax.random.uniform(kv, (Cin,), jnp.float32)

    fwd = jax.jit(transition_forward)
    out = jax.block_until_ready(fwd(x, gamma, beta, running_mean, running_var, w))

    assert out.shape == (N, Cout, H // 2, W // 2), out.shape
    out_f32 = out.astype(jnp.float32)
    assert bool(jnp.all(jnp.isfinite(out_f32)))

    ref = transition_reference(x, gamma, beta, running_mean, running_var, w)
    assert bool(jnp.allclose(out_f32, ref, rtol=2e-2, atol=2e-2)), \
        float(jnp.max(jnp.abs(out_f32 - ref)))

    print("KERNEL_OK")
</pallas_src>

<mosaic_0001>
module attributes {stable_mosaic.version = 11 : i64} {
  func.func @_bn_relu_conv_pool_kernel(%arg0: i32, %arg1: memref<32x16xbf16, #tpu.memory_space<vmem>>, %arg2: memref<1x16xf32, #tpu.memory_space<vmem>>, %arg3: memref<1x16xf32, #tpu.memory_space<vmem>>, %arg4: memref<16x128xbf16, #tpu.memory_space<vmem>>, %arg5: memref<32x128xbf16, #tpu.memory_space<vmem>>) attributes {dimension_semantics = [#tpu.dimension_semantics<parallel>], iteration_bounds = array<i64: 4>, scalar_prefetch = 0 : i64, scratch_operands = 0 : i64, tpu.core_type = #tpu.core_type<tc>, window_params = [{transform_indices = @transform_0, window_bounds = array<i64: 32, 16>}, {pipeline_mode = #tpu.pipeline_mode<synchronous>, transform_indices = @transform_1, window_bounds = array<i64: 1, 16>}, {pipeline_mode = #tpu.pipeline_mode<synchronous>, transform_indices = @transform_2, window_bounds = array<i64: 1, 16>}, {pipeline_mode = #tpu.pipeline_mode<synchronous>, transform_indices = @transform_3, window_bounds = array<i64: 16, 128>}, {transform_indices = @transform_4, window_bounds = array<i64: 32, 128>}]} {
    %c0 = arith.constant 0 : index
    %c0_0 = arith.constant 0 : index
    %0 = vector.load %arg1[%c0, %c0_0] : memref<32x16xbf16, #tpu.memory_space<vmem>>, vector<32x16xbf16>
    %1 = arith.extf %0 : vector<32x16xbf16> to vector<32x16xf32>
    %c0_1 = arith.constant 0 : index
    %c0_2 = arith.constant 0 : index
    %2 = vector.load %arg2[%c0_1, %c0_2] : memref<1x16xf32, #tpu.memory_space<vmem>>, vector<1x16xf32>
    %3 = vector.broadcast %2 : vector<1x16xf32> to vector<32x16xf32>
    %4 = arith.mulf %1, %3 : vector<32x16xf32>
    %c0_3 = arith.constant 0 : index
    %c0_4 = arith.constant 0 : index
    %5 = vector.load %arg3[%c0_3, %c0_4] : memref<1x16xf32, #tpu.memory_space<vmem>>, vector<1x16xf32>
    %6 = vector.broadcast %5 : vector<1x16xf32> to vector<32x16xf32>
    %7 = arith.addf %4, %6 : vector<32x16xf32>
    %cst = arith.constant 0.000000e+00 : f32
    %8 = vector.broadcast %cst : f32 to vector<32x16xf32>
    %9 = arith.maximumf %7, %8 : vector<32x16xf32>
    %10 = arith.truncf %9 : vector<32x16xf32> to vector<32x16xbf16>
    %c0_5 = arith.constant 0 : index
    %c0_6 = arith.constant 0 : index
    %11 = vector.load %arg4[%c0_5, %c0_6] : memref<16x128xbf16, #tpu.memory_space<vmem>>, vector<16x128xbf16>
    %cst_7 = arith.constant dense<0.000000e+00> : vector<32x128xf32>
    %12 = tpu.matmul %10, %11, %cst_7 {dimension_numbers = #tpu.dot_dimension_numbers<[1], [0], [0], [1], [0, 0, 1, 1], [], []>} : vector<32x16xbf16>, vector<16x128xbf16>, vector<32x128xf32> -> vector<32x128xf32>
    %13 = arith.truncf %12 : vector<32x128xf32> to vector<32x128xbf16>
    %c0_8 = arith.constant 0 : index
    %c0_9 = arith.constant 0 : index
    %14 = vector.load %arg5[%c0_8, %c0_9] : memref<32x128xbf16, #tpu.memory_space<vmem>>, vector<32x128xbf16>
    tpu.vector_store %arg5[%c0_8, %c0_9], %13 {strides = array<i32>} : memref<32x128xbf16, #tpu.memory_space<vmem>>, vector<32x128xbf16>,
    return
  }
  func.func @transform_0(%arg0: i32) -> (i32, i32) {
    %c0_i32 = arith.constant 0 : i32
    %c0_i32_0 = arith.constant 0 : i32
    return %arg0, %c0_i32 : i32, i32
  }
  func.func @transform_1(%arg0: i32) -> (i32, i32) {
    %c0_i32 = arith.constant 0 : i32
    %c0_i32_0 = arith.constant 0 : i32
    %c0_i32_1 = arith.constant 0 : i32
    return %c0_i32, %c0_i32_0 : i32, i32
  }
  func.func @transform_2(%arg0: i32) -> (i32, i32) {
    %c0_i32 = arith.constant 0 : i32
    %c0_i32_0 = arith.constant 0 : i32
    %c0_i32_1 = arith.constant 0 : i32
    return %c0_i32, %c0_i32_0 : i32, i32
  }
  func.func @transform_3(%arg0: i32) -> (i32, i32) {
    %c0_i32 = arith.constant 0 : i32
    %c0_i32_0 = arith.constant 0 : i32
    %c0_i32_1 = arith.constant 0 : i32
    return %c0_i32, %c0_i32_0 : i32, i32
  }
  func.func @transform_4(%arg0: i32) -> (i32, i32) {
    %c0_i32 = arith.constant 0 : i32
    %c0_i32_0 = arith.constant 0 : i32
    return %arg0, %c0_i32 : i32, i32
  }
}

</mosaic_0001>

<bundles_post_ra>
// kernel: tile.18
= control target key start
LH: loop header
LB: loop body
LE: loop exit
PB: predicated region body
PF: predicated region fallthrough
CT: control target
= control target key end

     0   :  { %s22_s0 = inlined_call_operand.vmem [shape: f32[4], index: 0, kind: input, shape index: {}]   ;;  %s23_s1 = inlined_call_operand.vmem [shape: f32[4,4], index: 1, kind: output, shape index: {}]  }
   0x1   :  { %v4_v0 = vld [vmem:[%s22_s0] ss:$0 sm:$0xff] }
   0x2   :  { %5 = vst [vmem:[%s23_s1] sm:$0xf] %v4_v0 }

// kernel: tile.19
= control target key start
LH: loop header
LB: loop body
LE: loop exit
PB: predicated region body
PF: predicated region fallthrough
CT: control target
= control target key end

     0   :  { %vm7_vm0 = vcmask 31744   ;;  %s37_s8 = smov 4   ;;  %s38_s9 = smov 8   ;;  %vm13_vm1 = vcmask 130144   ;;  %vm19_vm2 = vcmask 97344   ;;  %vm25_vm3 = vcmask 64544   ;;  %s55_s0 = inlined_call_operand.vmem [shape: f32[4,4], index: 0, kind: input, shape index: {}]   ;;  %s56_s1 = inlined_call_operand.vmem [shape: f32[1,16], index: 1, kind: output, shape index: {}]  }
   0x1   :  { %v4_v0 = vld [vmem:[%s55_s0] sm:$0xf]  ;;  %s36_s0 = smov 12  }
   0x2   :  { %5 = vst [vmem:[#allocation1] sm:$0xf] %v4_v0 }
   0x9   :  { %v10_v1 = vld [vmem:[#allocation1 + $0x3] sm:$0x1]   ;;  %v22_v2 = vld [vmem:[#allocation1 + $0x1] sm:$0x1]   ;;  %v6_v3 = vld [vmem:[#allocation1] sm:$0x1]  }
   0xa   :  { %11 = vrot.lane.b32.xlu0 %v10_v1, %s36_s0  ;;  %23 = vrot.lane.b32.xlu1 %v22_v2, %s37_s8  ;;  %v16_v4 = vld [vmem:[#allocation1 + $0x2] sm:$0x1]   ;;  %8 = vst.msk [vmem:[#allocation0] sm:$0x1] %vm7_vm0, %v6_v3  }
   0xe   :  { %17 = vrot.lane.b32.xlu0 %v16_v4, %s38_s9 }
  0x7c   :  { %v12_v5 = vpop.permute.xlu0 %11   ;;  %v24_v6 = vpop.permute.xlu1 %23  }
  0x7d   :  { %14 = vst.msk [vmem:[#allocation0] sm:$0x1] %vm13_vm1, %v12_v5  }
  0x80   :  { %v18_v7 = vpop.permute.xlu0 %17  }
  0x81   :  { %20 = vst.msk [vmem:[#allocation0] sm:$0x1] %vm19_vm2, %v18_v7  }
  0x82   :  { %26 = vst.msk [vmem:[#allocation0] sm:$0x1] %vm25_vm3, %v24_v6  }
  0x89   :  { %v30_v8 = vld [vmem:[#allocation0] sm:$0x1] }
  0x8a   :  { %32 = vst [vmem:[%s56_s1] sm:$0x1] %v30_v8 }

// kernel: transition_forward.1
= control target key start
LH: loop header
LB: loop body
LE: loop exit
PB: predicated region body
PF: predicated region fallthrough
CT: control target
= control target key end

     0   :  { %s473_s15 = smov 0   ;;  %s506_s0 = inlined_call_operand.vmem [shape: bf16[128,16], index: 0, kind: input, shape index: {}]   ;;  %s507_s1 = inlined_call_operand.vmem [shape: f32[1,16], index: 1, kind: input, shape index: {}]   ;;  %s508_s2 = inlined_call_operand.vmem [shape: f32[1,16], index: 2, kind: input, shape index: {}]   ;;  %s509_s3 = inlined_call_operand.vmem [shape: bf16[16,128], index: 3, kind: input, shape index: {}]   ;;  %s510_s4 = inlined_call_operand.vmem [shape: bf16[128,128], index: 4, kind: output, shape index: {}]  }
   0x1 LB: > { %s378_s16 = sadd.s32 4294967295, %s446_s15   ;;  %p382_p0 = scmp.ge.s32.totalorder %s446_s15, 1  ;;  %s446_s15 = sphi %s473_s15, %s14_s15  }
   0x2   : > { %p163_p1 = scmp.lt.s32.totalorder %s446_s15, 5 }
   0x4   : > { %p164_p2 = pnand %p382_p0, %p163_p1 }
   0x5   : > { %v439_v0 = vld [vmem:[%s509_s3] sm:$0xff] (!%p164_p2)   ;;  %s383_s19 = sshll.u32 (!%p164_p2), %s378_s16, 2  ;;  %vm246_vm0 = vcmask (!%p164_p2), 130048  }
   0x6   : > { %167 = sbr.rel (%p164_p2) target bundleno = 246 (0xf6), region = 36  ;;  %p190_p3 = scmp.lt.s32.totalorder (!%p164_p2), %s383_s19, 15  ;;  %425 = vmatprep.subr.bf16.mxu0 (!%p164_p2), %v439_v0  ;;  %v387_v3 = vld [vmem:[%s507_s1] ss:$0 sm:$0xff] (!%p164_p2) }
   0x7   : > { %426 = vmatpush3.bf16.msra.mxu0 (!%p164_p2), %v439_v0  ;;  %v388_v8 = vld [vmem:[%s508_s2] ss:$0 sm:$0xff] (!%p164_p2) }
   0xd   : > { %s512_s19 = smov (!%p190_p3, %s383_s19), 15 }
   0xe   : > { %s384_s20 = sshll.u32 %s512_s19, 2 }
   0xf   : > { %s193_s23 = scalar_lea.vmem %s506_s0, %s384_s20  ;;  %s199_s30 = scalar_lea.vmem %s510_s4, %s384_s20 }
  0x10   : > { %v403_v1 = vld [vmem:[%s193_s23] sm:$0xff]   ;;  %v420_v2 = vld [vmem:[%s193_s23 + $0x8] sm:$0xff]  }
  0x11   : > { %v404_v4 = vunpack.c.l.bf16 %v403_v1  ;;  %v405_v5 = vunpack.c.h.bf16 %v403_v1  ;;  %v408_v6 = vunpack.c.l.bf16 %v420_v2  ;;  %v409_v7 = vunpack.c.h.bf16 %v420_v2 }
  0x13   : > { %v217_v9 = vmul.f32 %v404_v4, %v387_v3  ;;  %v218_v10 = vmul.f32 %v405_v5, %v387_v3  ;;  %v219_v11 = vmul.f32 %v408_v6, %v387_v3  ;;  %v220_v12 = vmul.f32 %v409_v7, %v387_v3 }
  0x15   : > { %v228_v13 = vadd.f32 %v388_v8, %v217_v9  ;;  %v229_v14 = vadd.f32 %v388_v8, %v218_v10  ;;  %v230_v15 = vadd.f32 %v388_v8, %v219_v11  ;;  %v231_v16 = vadd.f32 %v388_v8, %v220_v12 }
  0x17   : > { %v232_v17 = vmax.f32 %v228_v13, 0.0  ;;  %v233_v18 = vmax.f32 %v229_v14, 0.0  ;;  %v234_v19 = vmax.f32 %v230_v15, 0.0  ;;  %v235_v20 = vmax.f32 %v231_v16, 0.0 }
  0x19   : > { %v236_v21 = vpack.c.bf16 %v233_v18, %v232_v17  ;;  %v237_v22 = vpack.c.bf16 %v235_v20, %v234_v19 }
  0x1b   : > { %427 = vmatprep.mubr.msk.bf16.mxu0 %vm246_vm0, %v236_v21 }
  0x1c   : > { %428 = vmatmul.mubr.msk.bf16.vlgmr.msra.gmra.mrb[0].mxu0 %vm246_vm0, %v237_v22 }
  0xef   : > { %v429_v23 = vpop.f32.mrb[0].mxu0 }
  0xf0   : > { %v287_v24 = vpop.f32.mrb[1].mxu0 }
  0xf1   : > { %v430_v25 = vpop.f32.mrb[2].mxu0 }
  0xf2   : > { %v418_v26 = vpack.c.bf16 %v430_v25, %v429_v23  ;;  %v290_v27 = vpop.f32.mrb[3].mxu0 }
  0xf3   : > { %v413_v28 = vpack.c.bf16 %v290_v27, %v287_v24 }
  0xf4   : > { %421 = vst [vmem:[%s199_s30 + $0x8] sm:$0xff] %v418_v26  }
  0xf5   : > { %414 = vst [vmem:[%s199_s30] sm:$0xff] %v413_v28  }
  0xf6 PF: > { %s14_s15 = sadd.s32 1, %s446_s15  }
  0xf7   : > { %p11_p4 = scmp.ge.s32.totalorder %s14_s15, 6  }
  0xf9   :  { %13 = sbr.rel (!%p11_p4) target bundleno = 1 (0x1), region = 66 }

</bundles_post_ra>
